<compile_context>
chip_gen: v6e
topology: v6e:2x2x1
jax: 0.10.0
libtpu: 0.0.40
codegen_flags: <defaults>
</compile_context>

<pallas_src>
import functools

import jax
import jax.numpy as jnp
from jax.experimental import pallas as pl
from jax.experimental.pallas import tpu as pltpu


# ----------------------------- in-kernel helpers -----------------------------


def _layer_norm(y, g, b, eps=1e-5):
    mean = jnp.mean(y, axis=-1, keepdims=True)
    var = jnp.mean(jnp.square(y - mean), axis=-1, keepdims=True)
    return (y - mean) * jax.lax.rsqrt(var + eps) * g + b


def _softmax_lastdim(s):
    m = jnp.max(s, axis=-1, keepdims=True)
    e = jnp.exp(s - m)
    # EUP reciprocal instead of a VALU divide sequence.
    return e * pl.reciprocal(jnp.sum(e, axis=-1, keepdims=True), approx=True)


# ------------------------------- Pallas kernels -------------------------------


def fused_proj_kernel(x_ref, w_ref, b_ref, o_ref):
    # x block: (R, E) f32; w: (E, 3E+2Ld) bf16 resident; b: (1, 3E+2Ld) f32.
    x = x_ref[...].astype(jnp.bfloat16)
    o_ref[...] = (
        jnp.dot(x, w_ref[...], preferred_element_type=jnp.float32) + b_ref[...]
    )


def attn_kernel(proj_ref, mask_ref, ctx_ref, lisa_ref, *, E, H, Dh, Ld,
                scale, lisa_scale):
    # proj block: (1, T, 3E+2Ld); mask: (1, 1, T); ctx out: (1, T, E);
    # lisa out: (1, T, T).  One batch element per grid step, all heads fused.
    fused = proj_ref[0]          # (T, 3E + 2*Ld) f32
    mask = mask_ref[0]           # (1, T) additive key-padding mask

    v = fused[:, 2 * E:3 * E].astype(jnp.bfloat16)

    # --- head 0: LISA (syntactically-informed) attention distribution ---
    # The standard QK^T/softmax for head 0 is never computed (it would be
    # discarded), saving 1/H of the attention FLOPs.
    ql = fused[:, 3 * E:3 * E + Ld].astype(jnp.bfloat16)
    kl = fused[:, 3 * E + Ld:].astype(jnp.bfloat16)
    s0 = jnp.dot(ql, kl.T, preferred_element_type=jnp.float32) * lisa_scale + mask
    p0 = _softmax_lastdim(s0)
    lisa_ref[0] = p0
    chunks = [jnp.dot(p0.astype(jnp.bfloat16), v[:, :Dh],
                      preferred_element_type=jnp.float32)]

    # --- remaining heads: standard scaled-dot-product attention ---
    q = (fused[:, :E] * scale).astype(jnp.bfloat16)
    k = fused[:, E:2 * E].astype(jnp.bfloat16)
    for h in range(1, H):        # static unroll; H is small
        lo, hi = h * Dh, (h + 1) * Dh
        s = jnp.dot(q[:, lo:hi], k[:, lo:hi].T,
                    preferred_element_type=jnp.float32) + mask
        p = _softmax_lastdim(s)
        chunks.append(jnp.dot(p.astype(jnp.bfloat16), v[:, lo:hi],
                              preferred_element_type=jnp.float32))

    # Single lane-dense (T, E) store (heads merged in-kernel).
    ctx_ref[0] = jnp.concatenate(chunks, axis=-1)


def out_proj_ln_kernel(ctx_ref, res_ref, wo_ref, bo_ref, g_ref, b_ref, o_ref):
    # Fused: output projection + residual add + LayerNorm0.
    attn = jnp.dot(ctx_ref[...].astype(jnp.bfloat16), wo_ref[...],
                   preferred_element_type=jnp.float32) + bo_ref[...]
    o_ref[...] = _layer_norm(res_ref[...] + attn, g_ref[...], b_ref[...])


def ffn_ln_kernel(x_ref, w1_ref, b1_ref, w2_ref, b2_ref, g_ref, b_ref, o_ref):
    # Fused: fc1 + relu + fc2 + residual add + LayerNorm1.
    x = x_ref[...]
    h = jnp.dot(x.astype(jnp.bfloat16), w1_ref[...],
                preferred_element_type=jnp.float32) + b1_ref[...]
    h = jnp.maximum(h, 0.0)
    z = jnp.dot(h.astype(jnp.bfloat16), w2_ref[...],
                preferred_element_type=jnp.float32) + b2_ref[...]
    o_ref[...] = _layer_norm(x + z, g_ref[...], b_ref[...])


# --------------------------------- wrappers ----------------------------------

_ROW_PARAMS = pltpu.CompilerParams(
    dimension_semantics=("parallel",),
    vmem_limit_bytes=64 * 1024 * 1024,
)


def _pick_block_rows(n_rows, requested):
    if requested is None:
        requested = 256
    if n_rows % requested == 0 and (requested % 8 == 0 or requested == n_rows):
        return requested
    return n_rows  # fall back to a single full-slab block


def pallas_fused_proj(x2, w_all, b_all, block_rows):
    R, E = x2.shape
    N = w_all.shape[1]
    return pl.pallas_call(
        fused_proj_kernel,
        out_shape=jax.ShapeDtypeStruct((R, N), jnp.float32),
        grid=(R // block_rows,),
        in_specs=[
            pl.BlockSpec((block_rows, E), lambda i: (i, 0)),
            pl.BlockSpec((E, N), lambda i: (0, 0)),      # resident weight
            pl.BlockSpec((1, N), lambda i: (0, 0)),
        ],
        out_specs=pl.BlockSpec((block_rows, N), lambda i: (i, 0)),
        compiler_params=_ROW_PARAMS,
    )(x2, w_all, b_all)


def pallas_attention(fused_bt, addmask, *, E, H, Dh, Ld):
    B, T, N = fused_bt.shape
    kern = functools.partial(attn_kernel, E=E, H=H, Dh=Dh, Ld=Ld,
                             scale=Dh ** -0.5, lisa_scale=Ld ** -0.5)
    return pl.pallas_call(
        kern,
        out_shape=(jax.ShapeDtypeStruct((B, T, E), jnp.float32),
                   jax.ShapeDtypeStruct((B, T, T), jnp.float32)),
        grid=(B,),
        in_specs=[
            pl.BlockSpec((1, T, N), lambda b: (b, 0, 0)),
            pl.BlockSpec((1, 1, T), lambda b: (b, 0, 0)),
        ],
        out_specs=(
            pl.BlockSpec((1, T, E), lambda b: (b, 0, 0)),
            pl.BlockSpec((1, T, T), lambda b: (b, 0, 0)),
        ),
        compiler_params=pltpu.CompilerParams(dimension_semantics=("parallel",)),
    )(fused_bt, addmask)


def pallas_out_proj_ln(ctx2, res2, wo, bo, g, b, block_rows):
    R, E = ctx2.shape
    return pl.pallas_call(
        out_proj_ln_kernel,
        out_shape=jax.ShapeDtypeStruct((R, E), jnp.float32),
        grid=(R // block_rows,),
        in_specs=[
            pl.BlockSpec((block_rows, E), lambda i: (i, 0)),
            pl.BlockSpec((block_rows, E), lambda i: (i, 0)),
            pl.BlockSpec((E, E), lambda i: (0, 0)),      # resident weight
            pl.BlockSpec((1, E), lambda i: (0, 0)),
            pl.BlockSpec((1, E), lambda i: (0, 0)),
            pl.BlockSpec((1, E), lambda i: (0, 0)),
        ],
        out_specs=pl.BlockSpec((block_rows, E), lambda i: (i, 0)),
        compiler_params=_ROW_PARAMS,
    )(ctx2, res2, wo, bo, g, b)


def pallas_ffn_ln(x2, w1, b1, w2, b2, g, b, block_rows):
    R, E = x2.shape
    F = w1.shape[1]
    return pl.pallas_call(
        ffn_ln_kernel,
        out_shape=jax.ShapeDtypeStruct((R, E), jnp.float32),
        grid=(R // block_rows,),
        in_specs=[
            pl.BlockSpec((block_rows, E), lambda i: (i, 0)),
            pl.BlockSpec((E, F), lambda i: (0, 0)),      # resident weight
            pl.BlockSpec((1, F), lambda i: (0, 0)),
            pl.BlockSpec((F, E), lambda i: (0, 0)),      # resident weight
            pl.BlockSpec((1, E), lambda i: (0, 0)),
            pl.BlockSpec((1, E), lambda i: (0, 0)),
            pl.BlockSpec((1, E), lambda i: (0, 0)),
        ],
        out_specs=pl.BlockSpec((block_rows, E), lambda i: (i, 0)),
        compiler_params=_ROW_PARAMS,
    )(x2, w1, b1, w2, b2, g, b)


# ------------------------------- layer forward --------------------------------


def init_params(key, E, H, FFN, LISA):
    ks = jax.random.split(key, 16)

    def w(k, fan_in, fan_out):
        return jax.random.normal(k, (fan_in, fan_out), jnp.float32) / jnp.sqrt(fan_in)

    def b(k, n):
        return 0.01 * jax.random.normal(k, (1, n), jnp.float32)

    return dict(
        wq=w(ks[0], E, E), bq=b(ks[1], E),
        wk=w(ks[2], E, E), bk=b(ks[3], E),
        wv=w(ks[4], E, E), bv=b(ks[5], E),
        wo=w(ks[6], E, E), bo=b(ks[7], E),
        w_lq=w(ks[8], E, LISA), b_lq=b(ks[9], LISA),
        w_lk=w(ks[10], E, LISA), b_lk=b(ks[11], LISA),
        w1=w(ks[12], E, FFN), b1=b(ks[13], FFN),
        w2=w(ks[14], FFN, E), b2=b(ks[15], E),
        ln0_g=jnp.ones((1, E), jnp.float32), ln0_b=jnp.zeros((1, E), jnp.float32),
        ln1_g=jnp.ones((1, E), jnp.float32), ln1_b=jnp.zeros((1, E), jnp.float32),
    )


@functools.partial(jax.jit, static_argnames=("num_heads", "block_rows"))
def lisa_encoder_layer(x, encoder_padding_mask, parse_heads, params, num_heads,
                       block_rows=None):
    """x: (T, B, E) f32; encoder_padding_mask: (B, T) bool (True = pad)."""
    del parse_heads  # training-only supervision of the LISA head
    T, B, E = x.shape
    H = num_heads
    Dh = E // H
    Ld = params["w_lq"].shape[1]
    br = _pick_block_rows(B * T, block_rows)

    # (T, B, E) -> (B*T, E) row slab (single layout transpose in / out).
    x_bt = jnp.transpose(x, (1, 0, 2))
    x2 = x_bt.reshape(B * T, E)

    # Fused QKV + LISA-q/k projection weights (bf16 for the MXU, f32 bias).
    w_all = jnp.concatenate(
        [params["wq"], params["wk"], params["wv"], params["w_lq"], params["w_lk"]],
        axis=1).astype(jnp.bfloat16)
    b_all = jnp.concatenate(
        [params["bq"], params["bk"], params["bv"], params["b_lq"], params["b_lk"]],
        axis=1)

    fused = pallas_fused_proj(x2, w_all, b_all, br)          # (B*T, 3E+2Ld)
    fused = fused.reshape(B, T, 3 * E + 2 * Ld)

    # Large finite negative instead of -inf so fully-padded rows don't NaN.
    addmask = jnp.where(encoder_padding_mask, -1e9, 0.0).astype(jnp.float32)
    addmask = addmask.reshape(B, 1, T)

    ctx, lisa_attn = pallas_attention(fused, addmask, E=E, H=H, Dh=Dh, Ld=Ld)

    # dropout = identity (eval); post-norm (encoder_normalize_before=False).
    y = pallas_out_proj_ln(ctx.reshape(B * T, E), x2,
                           params["wo"].astype(jnp.bfloat16), params["bo"],
                           params["ln0_g"], params["ln0_b"], br)

    out = pallas_ffn_ln(y,
                        params["w1"].astype(jnp.bfloat16), params["b1"],
                        params["w2"].astype(jnp.bfloat16), params["b2"],
                        params["ln1_g"], params["ln1_b"], br)

    out = jnp.transpose(out.reshape(B, T, E), (1, 0, 2))
    return out, lisa_attn


# ----------------------------- pure-JAX reference ------------------------------


def reference_forward(x, pad_mask, params, H):
    T, B, E = x.shape
    Dh = E // H
    hi = jax.lax.Precision.HIGHEST

    def lin(v, w, b):
        return jnp.einsum("...i,io->...o", v, w, precision=hi) + b[0]

    def ln(y, g, b):
        m = jnp.mean(y, -1, keepdims=True)
        var = jnp.mean(jnp.square(y - m), -1, keepdims=True)
        return (y - m) * jax.lax.rsqrt(var + 1e-5) * g[0] + b[0]

    addmask = jnp.where(pad_mask, -1e9, 0.0).astype(jnp.float32)  # (B,T)

    q = lin(x, params["wq"], params["bq"]) * (Dh ** -0.5)
    k = lin(x, params["wk"], params["bk"])
    v = lin(x, params["wv"], params["bv"])

    def split(t):
        return jnp.transpose(t.reshape(T, B, H, Dh), (1, 2, 0, 3))

    qh, kh, vh = split(q), split(k), split(v)
    s = jnp.einsum("bhtd,bhsd->bhts", qh, kh, precision=hi) + addmask[:, None, None, :]
    p = jax.nn.softmax(s, axis=-1)

    ql = jnp.transpose(lin(x, params["w_lq"], params["b_lq"]), (1, 0, 2))
    kl = jnp.transpose(lin(x, params["w_lk"], params["b_lk"]), (1, 0, 2))
    ls = jnp.einsum("btd,bsd->bts", ql, kl, precision=hi) * (ql.shape[-1] ** -0.5)
    ls = ls + addmask[:, None, :]
    lisa_p = jax.nn.softmax(ls, axis=-1)

    p = p.at[:, 0].set(lisa_p)
    ctx = jnp.einsum("bhts,bhsd->bhtd", p, vh, precision=hi)
    ctx = jnp.transpose(ctx, (2, 0, 1, 3)).reshape(T, B, E)
    attn_out = lin(ctx, params["wo"], params["bo"])

    y = ln(x + attn_out, params["ln0_g"], params["ln0_b"])
    h = jnp.maximum(lin(y, params["w1"], params["b1"]), 0.0)
    z = lin(h, params["w2"], params["b2"])
    out = ln(y + z, params["ln1_g"], params["ln1_b"])
    return out, lisa_p


# ----------------------------------- main --------------------------------------

if __name__ == "__main__":
    T, B, E, H, FFN, LISA = 8, 2, 32, 4, 64, 16
    key = jax.random.PRNGKey(0)
    kx, kp, kh = jax.random.split(key, 3)

    x = jax.random.normal(kx, (T, B, E), jnp.float32)
    encoder_padding_mask = jnp.zeros((B, T), dtype=bool).at[1, -2:].set(True)
    parse_heads = jax.random.randint(kh, (B, T), 0, T)
    params = init_params(kp, E, H, FFN, LISA)

    out, lisa_attn = lisa_encoder_layer(
        x, encoder_padding_mask, parse_heads, params,
        num_heads=H, block_rows=8)  # block_rows=8 exercises a 2-step row grid
    jax.block_until_ready((out, lisa_attn))

    ref_out, ref_lisa = reference_forward(x, encoder_padding_mask, params, H)
    assert out.shape == (T, B, E) and lisa_attn.shape == (B, T, T)
    # bf16 MXU inputs with f32 accumulation -> modest tolerance vs f32 reference.
    assert jnp.allclose(out, ref_out, atol=5e-2, rtol=5e-2)
    assert jnp.allclose(lisa_attn, ref_lisa, atol=5e-2, rtol=5e-2)

    print("KERNEL_OK")
</pallas_src>

<mosaic_0001>
module attributes {stable_mosaic.version = 11 : i64} {
  func.func @fused_proj_kernel(%arg0: i32, %arg1: memref<8x32xf32, #tpu.memory_space<vmem>>, %arg2: memref<32x128xbf16, #tpu.memory_space<vmem>>, %arg3: memref<1x128xf32, #tpu.memory_space<vmem>>, %arg4: memref<8x128xf32, #tpu.memory_space<vmem>>) attributes {dimension_semantics = [#tpu.dimension_semantics<parallel>], iteration_bounds = array<i64: 2>, scalar_prefetch = 0 : i64, scratch_operands = 0 : i64, tpu.core_type = #tpu.core_type<tc>, window_params = [{transform_indices = @transform_0, window_bounds = array<i64: 8, 32>}, {pipeline_mode = #tpu.pipeline_mode<synchronous>, transform_indices = @transform_1, window_bounds = array<i64: 32, 128>}, {pipeline_mode = #tpu.pipeline_mode<synchronous>, transform_indices = @transform_2, window_bounds = array<i64: 1, 128>}, {transform_indices = @transform_3, window_bounds = array<i64: 8, 128>}]} {
    %c0 = arith.constant 0 : index
    %c0_0 = arith.constant 0 : index
    %0 = vector.load %arg1[%c0, %c0_0] : memref<8x32xf32, #tpu.memory_space<vmem>>, vector<8x32xf32>
    %1 = arith.truncf %0 : vector<8x32xf32> to vector<8x32xbf16>
    %c0_1 = arith.constant 0 : index
    %c0_2 = arith.constant 0 : index
    %2 = vector.load %arg2[%c0_1, %c0_2] : memref<32x128xbf16, #tpu.memory_space<vmem>>, vector<32x128xbf16>
    %cst = arith.constant dense<0.000000e+00> : vector<8x128xf32>
    %3 = tpu.matmul %1, %2, %cst {dimension_numbers = #tpu.dot_dimension_numbers<[1], [0], [0], [1], [0, 0, 1, 1], [], []>} : vector<8x32xbf16>, vector<32x128xbf16>, vector<8x128xf32> -> vector<8x128xf32>
    %c0_3 = arith.constant 0 : index
    %c0_4 = arith.constant 0 : index
    %4 = vector.load %arg3[%c0_3, %c0_4] : memref<1x128xf32, #tpu.memory_space<vmem>>, vector<1x128xf32>
    %5 = vector.broadcast %4 : vector<1x128xf32> to vector<8x128xf32>
    %6 = arith.addf %3, %5 : vector<8x128xf32>
    %c0_5 = arith.constant 0 : index
    %c0_6 = arith.constant 0 : index
    %7 = vector.load %arg4[%c0_5, %c0_6] : memref<8x128xf32, #tpu.memory_space<vmem>>, vector<8x128xf32>
    tpu.vector_store %arg4[%c0_5, %c0_6], %6 {strides = array<i32>} : memref<8x128xf32, #tpu.memory_space<vmem>>, vector<8x128xf32>,
    return
  }
  func.func @transform_0(%arg0: i32) -> (i32, i32) {
    %c0_i32 = arith.constant 0 : i32
    %c0_i32_0 = arith.constant 0 : i32
    return %arg0, %c0_i32 : i32, i32
  }
  func.func @transform_1(%arg0: i32) -> (i32, i32) {
    %c0_i32 = arith.constant 0 : i32
    %c0_i32_0 = arith.constant 0 : i32
    %c0_i32_1 = arith.constant 0 : i32
    return %c0_i32, %c0_i32_0 : i32, i32
  }
  func.func @transform_2(%arg0: i32) -> (i32, i32) {
    %c0_i32 = arith.constant 0 : i32
    %c0_i32_0 = arith.constant 0 : i32
    %c0_i32_1 = arith.constant 0 : i32
    return %c0_i32, %c0_i32_0 : i32, i32
  }
  func.func @transform_3(%arg0: i32) -> (i32, i32) {
    %c0_i32 = arith.constant 0 : i32
    %c0_i32_0 = arith.constant 0 : i32
    return %arg0, %c0_i32 : i32, i32
  }
}

module attributes {stable_mosaic.version = 11 : i64} {
  func.func @attn_kernel(%arg0: i32, %arg1: memref<1x8x128xf32, #tpu.memory_space<vmem>>, %arg2: memref<1x1x8xf32, #tpu.memory_space<vmem>>, %arg3: memref<1x8x32xf32, #tpu.memory_space<vmem>>, %arg4: memref<1x8x8xf32, #tpu.memory_space<vmem>>) attributes {dimension_semantics = [#tpu.dimension_semantics<parallel>], iteration_bounds = array<i64: 2>, scalar_prefetch = 0 : i64, scratch_operands = 0 : i64, tpu.core_type = #tpu.core_type<tc>, window_params = [{transform_indices = @transform_0, window_bounds = array<i64: 1, 8, 128>}, {transform_indices = @transform_1, window_bounds = array<i64: 1, 1, 8>}, {transform_indices = @transform_2, window_bounds = array<i64: 1, 8, 32>}, {transform_indices = @transform_3, window_bounds = array<i64: 1, 8, 8>}]} {
    %c0 = arith.constant 0 : index
    %c0_0 = arith.constant 0 : index
    %c0_1 = arith.constant 0 : index
    %0 = vector.load %arg1[%c0, %c0_0, %c0_1] : memref<1x8x128xf32, #tpu.memory_space<vmem>>, vector<1x8x128xf32>
    %1 = vector.shape_cast %0 : vector<1x8x128xf32> to vector<8x128xf32>
    %c0_2 = arith.constant 0 : index
    %c0_3 = arith.constant 0 : index
    %c0_4 = arith.constant 0 : index
    %2 = vector.load %arg2[%c0_2, %c0_3, %c0_4] : memref<1x1x8xf32, #tpu.memory_space<vmem>>, vector<1x1x8xf32>
    %3 = vector.shape_cast %2 : vector<1x1x8xf32> to vector<1x8xf32>
    %4 = vector.extract_strided_slice %1 {offsets = [0, 64], sizes = [8, 32], strides = [1, 1]} : vector<8x128xf32> to vector<8x32xf32>
    %5 = arith.truncf %4 : vector<8x32xf32> to vector<8x32xbf16>
    %6 = vector.extract_strided_slice %1 {offsets = [0, 96], sizes = [8, 16], strides = [1, 1]} : vector<8x128xf32> to vector<8x16xf32>
    %7 = arith.truncf %6 : vector<8x16xf32> to vector<8x16xbf16>
    %8 = vector.extract_strided_slice %1 {offsets = [0, 112], sizes = [8, 16], strides = [1, 1]} : vector<8x128xf32> to vector<8x16xf32>
    %9 = arith.truncf %8 : vector<8x16xf32> to vector<8x16xbf16>
    %10 = tpu.transpose %9, [1, 0] : vector<8x16xbf16> -> vector<16x8xbf16>
    %cst = arith.constant dense<0.000000e+00> : vector<8x8xf32>
    %11 = tpu.matmul %7, %10, %cst {dimension_numbers = #tpu.dot_dimension_numbers<[1], [0], [0], [1], [0, 0, 1, 1], [], []>} : vector<8x16xbf16>, vector<16x8xbf16>, vector<8x8xf32> -> vector<8x8xf32>
    %cst_5 = arith.constant 2.500000e-01 : f32
    %12 = vector.broadcast %cst_5 : f32 to vector<8x8xf32>
    %13 = arith.mulf %11, %12 : vector<8x8xf32>
    %14 = vector.broadcast %3 : vector<1x8xf32> to vector<8x8xf32>
    %15 = arith.addf %13, %14 : vector<8x8xf32>
    %cst_6 = arith.constant dense<0xFF800000> : vector<8xf32>
    %16 = vector.multi_reduction <maximumf>, %15, %cst_6 [1] : vector<8x8xf32> to vector<8xf32>
    %17 = vector.shape_cast %16 : vector<8xf32> to vector<8x1xf32>
    %18 = vector.broadcast %17 : vector<8x1xf32> to vector<8x8xf32>
    %19 = arith.subf %15, %18 : vector<8x8xf32>
    %20 = math.exp %19 : vector<8x8xf32>
    %cst_7 = arith.constant dense<0.000000e+00> : vector<8xf32>
    %21 = vector.multi_reduction <add>, %20, %cst_7 [1] : vector<8x8xf32> to vector<8xf32>
    %22 = vector.shape_cast %21 : vector<8xf32> to vector<8x1xf32>
    %23 = tpu.reciprocal %22 {approx = true} : vector<8x1xf32> -> vector<8x1xf32>
    %24 = vector.broadcast %23 : vector<8x1xf32> to vector<8x8xf32>
    %25 = arith.mulf %20, %24 : vector<8x8xf32>
    %c0_8 = arith.constant 0 : index
    %c0_9 = arith.constant 0 : index
    %c0_10 = arith.constant 0 : index
    %26 = vector.load %arg4[%c0_8, %c0_9, %c0_10] : memref<1x8x8xf32, #tpu.memory_space<vmem>>, vector<1x8x8xf32>
    %27 = vector.shape_cast %26 : vector<1x8x8xf32> to vector<8x8xf32>
    %28 = vector.shape_cast %25 : vector<8x8xf32> to vector<1x8x8xf32>
    tpu.vector_store %arg4[%c0_8, %c0_9, %c0_10], %28 {strides = array<i32>} : memref<1x8x8xf32, #tpu.memory_space<vmem>>, vector<1x8x8xf32>,
    %29 = arith.truncf %25 : vector<8x8xf32> to vector<8x8xbf16>
    %30 = vector.extract_strided_slice %5 {offsets = [0, 0], sizes = [8, 8], strides = [1, 1]} : vector<8x32xbf16> to vector<8x8xbf16>
    %cst_11 = arith.constant dense<0.000000e+00> : vector<8x8xf32>
    %31 = tpu.matmul %29, %30, %cst_11 {dimension_numbers = #tpu.dot_dimension_numbers<[1], [0], [0], [1], [0, 0, 1, 1], [], []>} : vector<8x8xbf16>, vector<8x8xbf16>, vector<8x8xf32> -> vector<8x8xf32>
    %32 = vector.extract_strided_slice %1 {offsets = [0, 0], sizes = [8, 32], strides = [1, 1]} : vector<8x128xf32> to vector<8x32xf32>
    %cst_12 = arith.constant 0.353553385 : f32
    %33 = vector.broadcast %cst_12 : f32 to vector<8x32xf32>
    %34 = arith.mulf %32, %33 : vector<8x32xf32>
    %35 = arith.truncf %34 : vector<8x32xf32> to vector<8x32xbf16>
    %36 = vector.extract_strided_slice %1 {offsets = [0, 32], sizes = [8, 32], strides = [1, 1]} : vector<8x128xf32> to vector<8x32xf32>
    %37 = arith.truncf %36 : vector<8x32xf32> to vector<8x32xbf16>
    %38 = vector.extract_strided_slice %35 {offsets = [0, 8], sizes = [8, 8], strides = [1, 1]} : vector<8x32xbf16> to vector<8x8xbf16>
    %39 = vector.extract_strided_slice %37 {offsets = [0, 8], sizes = [8, 8], strides = [1, 1]} : vector<8x32xbf16> to vector<8x8xbf16>
    %40 = tpu.transpose %39, [1, 0] : vector<8x8xbf16> -> vector<8x8xbf16>
    %cst_13 = arith.constant dense<0.000000e+00> : vector<8x8xf32>
    %41 = tpu.matmul %38, %40, %cst_13 {dimension_numbers = #tpu.dot_dimension_numbers<[1], [0], [0], [1], [0, 0, 1, 1], [], []>} : vector<8x8xbf16>, vector<8x8xbf16>, vector<8x8xf32> -> vector<8x8xf32>
    %42 = vector.broadcast %3 : vector<1x8xf32> to vector<8x8xf32>
    %43 = arith.addf %41, %42 : vector<8x8xf32>
    %cst_14 = arith.constant dense<0xFF800000> : vector<8xf32>
    %44 = vector.multi_reduction <maximumf>, %43, %cst_14 [1] : vector<8x8xf32> to vector<8xf32>
    %45 = vector.shape_cast %44 : vector<8xf32> to vector<8x1xf32>
    %46 = vector.broadcast %45 : vector<8x1xf32> to vector<8x8xf32>
    %47 = arith.subf %43, %46 : vector<8x8xf32>
    %48 = math.exp %47 : vector<8x8xf32>
    %cst_15 = arith.constant dense<0.000000e+00> : vector<8xf32>
    %49 = vector.multi_reduction <add>, %48, %cst_15 [1] : vector<8x8xf32> to vector<8xf32>
    %50 = vector.shape_cast %49 : vector<8xf32> to vector<8x1xf32>
    %51 = tpu.reciprocal %50 {approx = true} : vector<8x1xf32> -> vector<8x1xf32>
    %52 = vector.broadcast %51 : vector<8x1xf32> to vector<8x8xf32>
    %53 = arith.mulf %48, %52 : vector<8x8xf32>
    %54 = arith.truncf %53 : vector<8x8xf32> to vector<8x8xbf16>
    %55 = vector.extract_strided_slice %5 {offsets = [0, 8], sizes = [8, 8], strides = [1, 1]} : vector<8x32xbf16> to vector<8x8xbf16>
    %cst_16 = arith.constant dense<0.000000e+00> : vector<8x8xf32>
    %56 = tpu.matmul %54, %55, %cst_16 {dimension_numbers = #tpu.dot_dimension_numbers<[1], [0], [0], [1], [0, 0, 1, 1], [], []>} : vector<8x8xbf16>, vector<8x8xbf16>, vector<8x8xf32> -> vector<8x8xf32>
    %57 = vector.extract_strided_slice %35 {offsets = [0, 16], sizes = [8, 8], strides = [1, 1]} : vector<8x32xbf16> to vector<8x8xbf16>
    %58 = vector.extract_strided_slice %37 {offsets = [0, 16], sizes = [8, 8], strides = [1, 1]} : vector<8x32xbf16> to vector<8x8xbf16>
    %59 = tpu.transpose %58, [1, 0] : vector<8x8xbf16> -> vector<8x8xbf16>
    %cst_17 = arith.constant dense<0.000000e+00> : vector<8x8xf32>
    %60 = tpu.matmul %57, %59, %cst_17 {dimension_numbers = #tpu.dot_dimension_numbers<[1], [0], [0], [1], [0, 0, 1, 1], [], []>} : vector<8x8xbf16>, vector<8x8xbf16>, vector<8x8xf32> -> vector<8x8xf32>
    %61 = vector.broadcast %3 : vector<1x8xf32> to vector<8x8xf32>
    %62 = arith.addf %60, %61 : vector<8x8xf32>
    %cst_18 = arith.constant dense<0xFF800000> : vector<8xf32>
    %63 = vector.multi_reduction <maximumf>, %62, %cst_18 [1] : vector<8x8xf32> to vector<8xf32>
    %64 = vector.shape_cast %63 : vector<8xf32> to vector<8x1xf32>
    %65 = vector.broadcast %64 : vector<8x1xf32> to vector<8x8xf32>
    %66 = arith.subf %62, %65 : vector<8x8xf32>
    %67 = math.exp %66 : vector<8x8xf32>
    %cst_19 = arith.constant dense<0.000000e+00> : vector<8xf32>
    %68 = vector.multi_reduction <add>, %67, %cst_19 [1] : vector<8x8xf32> to vector<8xf32>
    %69 = vector.shape_cast %68 : vector<8xf32> to vector<8x1xf32>
    %70 = tpu.reciprocal %69 {approx = true} : vector<8x1xf32> -> vector<8x1xf32>
    %71 = vector.broadcast %70 : vector<8x1xf32> to vector<8x8xf32>
    %72 = arith.mulf %67, %71 : vector<8x8xf32>
    %73 = arith.truncf %72 : vector<8x8xf32> to vector<8x8xbf16>
    %74 = vector.extract_strided_slice %5 {offsets = [0, 16], sizes = [8, 8], strides = [1, 1]} : vector<8x32xbf16> to vector<8x8xbf16>
    %cst_20 = arith.constant dense<0.000000e+00> : vector<8x8xf32>
    %75 = tpu.matmul %73, %74, %cst_20 {dimension_numbers = #tpu.dot_dimension_numbers<[1], [0], [0], [1], [0, 0, 1, 1], [], []>} : vector<8x8xbf16>, vector<8x8xbf16>, vector<8x8xf32> -> vector<8x8xf32>
    %76 = vector.extract_strided_slice %35 {offsets = [0, 24], sizes = [8, 8], strides = [1, 1]} : vector<8x32xbf16> to vector<8x8xbf16>
    %77 = vector.extract_strided_slice %37 {offsets = [0, 24], sizes = [8, 8], strides = [1, 1]} : vector<8x32xbf16> to vector<8x8xbf16>
    %78 = tpu.transpose %77, [1, 0] : vector<8x8xbf16> -> vector<8x8xbf16>
    %cst_21 = arith.constant dense<0.000000e+00> : vector<8x8xf32>
    %79 = tpu.matmul %76, %78, %cst_21 {dimension_numbers = #tpu.dot_dimension_numbers<[1], [0], [0], [1], [0, 0, 1, 1], [], []>} : vector<8x8xbf16>, vector<8x8xbf16>, vector<8x8xf32> -> vector<8x8xf32>
    %80 = vector.broadcast %3 : vector<1x8xf32> to vector<8x8xf32>
    %81 = arith.addf %79, %80 : vector<8x8xf32>
    %cst_22 = arith.constant dense<0xFF800000> : vector<8xf32>
    %82 = vector.multi_reduction <maximumf>, %81, %cst_22 [1] : vector<8x8xf32> to vector<8xf32>
    %83 = vector.shape_cast %82 : vector<8xf32> to vector<8x1xf32>
    %84 = vector.broadcast %83 : vector<8x1xf32> to vector<8x8xf32>
    %85 = arith.subf %81, %84 : vector<8x8xf32>
    %86 = math.exp %85 : vector<8x8xf32>
    %cst_23 = arith.constant dense<0.000000e+00> : vector<8xf32>
    %87 = vector.multi_reduction <add>, %86, %cst_23 [1] : vector<8x8xf32> to vector<8xf32>
    %88 = vector.shape_cast %87 : vector<8xf32> to vector<8x1xf32>
    %89 = tpu.reciprocal %88 {approx = true} : vector<8x1xf32> -> vector<8x1xf32>
    %90 = vector.broadcast %89 : vector<8x1xf32> to vector<8x8xf32>
    %91 = arith.mulf %86, %90 : vector<8x8xf32>
    %92 = arith.truncf %91 : vector<8x8xf32> to vector<8x8xbf16>
    %93 = vector.extract_strided_slice %5 {offsets = [0, 24], sizes = [8, 8], strides = [1, 1]} : vector<8x32xbf16> to vector<8x8xbf16>
    %cst_24 = arith.constant dense<0.000000e+00> : vector<8x8xf32>
    %94 = tpu.matmul %92, %93, %cst_24 {dimension_numbers = #tpu.dot_dimension_numbers<[1], [0], [0], [1], [0, 0, 1, 1], [], []>} : vector<8x8xbf16>, vector<8x8xbf16>, vector<8x8xf32> -> vector<8x8xf32>
    %95 = tpu.concatenate %31, %56, %75, %94 in 1 : vector<8x8xf32>, vector<8x8xf32>, vector<8x8xf32>, vector<8x8xf32> -> vector<8x32xf32>
    %c0_25 = arith.constant 0 : index
    %c0_26 = arith.constant 0 : index
    %c0_27 = arith.constant 0 : index
    %96 = vector.load %arg3[%c0_25, %c0_26, %c0_27] : memref<1x8x32xf32, #tpu.memory_space<vmem>>, vector<1x8x32xf32>
    %97 = vector.shape_cast %96 : vector<1x8x32xf32> to vector<8x32xf32>
    %98 = vector.shape_cast %95 : vector<8x32xf32> to vector<1x8x32xf32>
    tpu.vector_store %arg3[%c0_25, %c0_26, %c0_27], %98 {strides = array<i32>} : memref<1x8x32xf32, #tpu.memory_space<vmem>>, vector<1x8x32xf32>,
    return
  }
  func.func @transform_0(%arg0: i32) -> (i32, i32, i32) {
    %c0_i32 = arith.constant 0 : i32
    %c0_i32_0 = arith.constant 0 : i32
    %c0_i32_1 = arith.constant 0 : i32
    return %arg0, %c0_i32, %c0_i32_0 : i32, i32, i32
  }
  func.func @transform_1(%arg0: i32) -> (i32, i32, i32) {
    %c0_i32 = arith.constant 0 : i32
    %c0_i32_0 = arith.constant 0 : i32
    %c0_i32_1 = arith.constant 0 : i32
    return %arg0, %c0_i32, %c0_i32_0 : i32, i32, i32
  }
  func.func @transform_2(%arg0: i32) -> (i32, i32, i32) {
    %c0_i32 = arith.constant 0 : i32
    %c0_i32_0 = arith.constant 0 : i32
    %c0_i32_1 = arith.constant 0 : i32
    return %arg0, %c0_i32, %c0_i32_0 : i32, i32, i32
  }
  func.func @transform_3(%arg0: i32) -> (i32, i32, i32) {
    %c0_i32 = arith.constant 0 : i32
    %c0_i32_0 = arith.constant 0 : i32
    %c0_i32_1 = arith.constant 0 : i32
    return %arg0, %c0_i32, %c0_i32_0 : i32, i32, i32
  }
}

module attributes {stable_mosaic.version = 11 : i64} {
  func.func @out_proj_ln_kernel(%arg0: i32, %arg1: memref<8x32xf32, #tpu.memory_space<vmem>>, %arg2: memref<8x32xf32, #tpu.memory_space<vmem>>, %arg3: memref<32x32xbf16, #tpu.memory_space<vmem>>, %arg4: memref<1x32xf32, #tpu.memory_space<vmem>>, %arg5: memref<1x32xf32, #tpu.memory_space<vmem>>, %arg6: memref<1x32xf32, #tpu.memory_space<vmem>>, %arg7: memref<8x32xf32, #tpu.memory_space<vmem>>) attributes {dimension_semantics = [#tpu.dimension_semantics<parallel>], iteration_bounds = array<i64: 2>, scalar_prefetch = 0 : i64, scratch_operands = 0 : i64, tpu.core_type = #tpu.core_type<tc>, window_params = [{transform_indices = @transform_0, window_bounds = array<i64: 8, 32>}, {transform_indices = @transform_1, window_bounds = array<i64: 8, 32>}, {pipeline_mode = #tpu.pipeline_mode<synchronous>, transform_indices = @transform_2, window_bounds = array<i64: 32, 32>}, {pipeline_mode = #tpu.pipeline_mode<synchronous>, transform_indices = @transform_3, window_bounds = array<i64: 1, 32>}, {pipeline_mode = #tpu.pipeline_mode<synchronous>, transform_indices = @transform_4, window_bounds = array<i64: 1, 32>}, {pipeline_mode = #tpu.pipeline_mode<synchronous>, transform_indices = @transform_5, window_bounds = array<i64: 1, 32>}, {transform_indices = @transform_6, window_bounds = array<i64: 8, 32>}]} {
    %c0 = arith.constant 0 : index
    %c0_0 = arith.constant 0 : index
    %0 = vector.load %arg1[%c0, %c0_0] : memref<8x32xf32, #tpu.memory_space<vmem>>, vector<8x32xf32>
    %1 = arith.truncf %0 : vector<8x32xf32> to vector<8x32xbf16>
    %c0_1 = arith.constant 0 : index
    %c0_2 = arith.constant 0 : index
    %2 = vector.load %arg3[%c0_1, %c0_2] : memref<32x32xbf16, #tpu.memory_space<vmem>>, vector<32x32xbf16>
    %cst = arith.constant dense<0.000000e+00> : vector<8x32xf32>
    %3 = tpu.matmul %1, %2, %cst {dimension_numbers = #tpu.dot_dimension_numbers<[1], [0], [0], [1], [0, 0, 1, 1], [], []>} : vector<8x32xbf16>, vector<32x32xbf16>, vector<8x32xf32> -> vector<8x32xf32>
    %c0_3 = arith.constant 0 : index
    %c0_4 = arith.constant 0 : index
    %4 = vector.load %arg4[%c0_3, %c0_4] : memref<1x32xf32, #tpu.memory_space<vmem>>, vector<1x32xf32>
    %5 = vector.broadcast %4 : vector<1x32xf32> to vector<8x32xf32>
    %6 = arith.addf %3, %5 : vector<8x32xf32>
    %c0_5 = arith.constant 0 : index
    %c0_6 = arith.constant 0 : index
    %7 = vector.load %arg2[%c0_5, %c0_6] : memref<8x32xf32, #tpu.memory_space<vmem>>, vector<8x32xf32>
    %8 = arith.addf %7, %6 : vector<8x32xf32>
    %c0_7 = arith.constant 0 : index
    %c0_8 = arith.constant 0 : index
    %9 = vector.load %arg5[%c0_7, %c0_8] : memref<1x32xf32, #tpu.memory_space<vmem>>, vector<1x32xf32>
    %c0_9 = arith.constant 0 : index
    %c0_10 = arith.constant 0 : index
    %10 = vector.load %arg6[%c0_9, %c0_10] : memref<1x32xf32, #tpu.memory_space<vmem>>, vector<1x32xf32>
    %cst_11 = arith.constant dense<0.000000e+00> : vector<8xf32>
    %11 = vector.multi_reduction <add>, %8, %cst_11 [1] : vector<8x32xf32> to vector<8xf32>
    %12 = vector.shape_cast %11 : vector<8xf32> to vector<8x1xf32>
    %cst_12 = arith.constant 3.200000e+01 : f32
    %13 = vector.broadcast %cst_12 : f32 to vector<8x1xf32>
    %14 = arith.divf %12, %13 : vector<8x1xf32>
    %15 = vector.broadcast %14 : vector<8x1xf32> to vector<8x32xf32>
    %16 = arith.subf %8, %15 : vector<8x32xf32>
    %17 = arith.mulf %16, %16 : vector<8x32xf32>
    %cst_13 = arith.constant dense<0.000000e+00> : vector<8xf32>
    %18 = vector.multi_reduction <add>, %17, %cst_13 [1] : vector<8x32xf32> to vector<8xf32>
    %19 = vector.shape_cast %18 : vector<8xf32> to vector<8x1xf32>
    %cst_14 = arith.constant 3.200000e+01 : f32
    %20 = vector.broadcast %cst_14 : f32 to vector<8x1xf32>
    %21 = arith.divf %19, %20 : vector<8x1xf32>
    %22 = vector.broadcast %14 : vector<8x1xf32> to vector<8x32xf32>
    %23 = arith.subf %8, %22 : vector<8x32xf32>
    %cst_15 = arith.constant 9.99999974E-6 : f32
    %24 = vector.broadcast %cst_15 : f32 to vector<8x1xf32>
    %25 = arith.addf %21, %24 : vector<8x1xf32>
    %26 = math.rsqrt %25 : vector<8x1xf32>
    %27 = vector.broadcast %26 : vector<8x1xf32> to vector<8x32xf32>
    %28 = arith.mulf %23, %27 : vector<8x32xf32>
    %29 = vector.broadcast %9 : vector<1x32xf32> to vector<8x32xf32>
    %30 = arith.mulf %28, %29 : vector<8x32xf32>
    %31 = vector.broadcast %10 : vector<1x32xf32> to vector<8x32xf32>
    %32 = arith.addf %30, %31 : vector<8x32xf32>
    %c0_16 = arith.constant 0 : index
    %c0_17 = arith.constant 0 : index
    %33 = vector.load %arg7[%c0_16, %c0_17] : memref<8x32xf32, #tpu.memory_space<vmem>>, vector<8x32xf32>
    tpu.vector_store %arg7[%c0_16, %c0_17], %32 {strides = array<i32>} : memref<8x32xf32, #tpu.memory_space<vmem>>, vector<8x32xf32>,
    return
  }
  func.func @transform_0(%arg0: i32) -> (i32, i32) {
    %c0_i32 = arith.constant 0 : i32
    %c0_i32_0 = arith.constant 0 : i32
    return %arg0, %c0_i32 : i32, i32
  }
  func.func @transform_1(%arg0: i32) -> (i32, i32) {
    %c0_i32 = arith.constant 0 : i32
    %c0_i32_0 = arith.constant 0 : i32
    return %arg0, %c0_i32 : i32, i32
  }
  func.func @transform_2(%arg0: i32) -> (i32, i32) {
    %c0_i32 = arith.constant 0 : i32
    %c0_i32_0 = arith.constant 0 : i32
    %c0_i32_1 = arith.constant 0 : i32
    return %c0_i32, %c0_i32_0 : i32, i32
  }
  func.func @transform_3(%arg0: i32) -> (i32, i32) {
    %c0_i32 = arith.constant 0 : i32
    %c0_i32_0 = arith.constant 0 : i32
    %c0_i32_1 = arith.constant 0 : i32
    return %c0_i32, %c0_i32_0 : i32, i32
  }
  func.func @transform_4(%arg0: i32) -> (i32, i32) {
    %c0_i32 = arith.constant 0 : i32
    %c0_i32_0 = arith.constant 0 : i32
    %c0_i32_1 = arith.constant 0 : i32
    return %c0_i32, %c0_i32_0 : i32, i32
  }
  func.func @transform_5(%arg0: i32) -> (i32, i32) {
    %c0_i32 = arith.constant 0 : i32
    %c0_i32_0 = arith.constant 0 : i32
    %c0_i32_1 = arith.constant 0 : i32
    return %c0_i32, %c0_i32_0 : i32, i32
  }
  func.func @transform_6(%arg0: i32) -> (i32, i32) {
    %c0_i32 = arith.constant 0 : i32
    %c0_i32_0 = arith.constant 0 : i32
    return %arg0, %c0_i32 : i32, i32
  }
}

module attributes {stable_mosaic.version = 11 : i64} {
  func.func @ffn_ln_kernel(%arg0: i32, %arg1: memref<8x32xf32, #tpu.memory_space<vmem>>, %arg2: memref<32x64xbf16, #tpu.memory_space<vmem>>, %arg3: memref<1x64xf32, #tpu.memory_space<vmem>>, %arg4: memref<64x32xbf16, #tpu.memory_space<vmem>>, %arg5: memref<1x32xf32, #tpu.memory_space<vmem>>, %arg6: memref<1x32xf32, #tpu.memory_space<vmem>>, %arg7: memref<1x32xf32, #tpu.memory_space<vmem>>, %arg8: memref<8x32xf32, #tpu.memory_space<vmem>>) attributes {dimension_semantics = [#tpu.dimension_semantics<parallel>], iteration_bounds = array<i64: 2>, scalar_prefetch = 0 : i64, scratch_operands = 0 : i64, tpu.core_type = #tpu.core_type<tc>, window_params = [{transform_indices = @transform_0, window_bounds = array<i64: 8, 32>}, {pipeline_mode = #tpu.pipeline_mode<synchronous>, transform_indices = @transform_1, window_bounds = array<i64: 32, 64>}, {pipeline_mode = #tpu.pipeline_mode<synchronous>, transform_indices = @transform_2, window_bounds = array<i64: 1, 64>}, {pipeline_mode = #tpu.pipeline_mode<synchronous>, transform_indices = @transform_3, window_bounds = array<i64: 64, 32>}, {pipeline_mode = #tpu.pipeline_mode<synchronous>, transform_indices = @transform_4, window_bounds = array<i64: 1, 32>}, {pipeline_mode = #tpu.pipeline_mode<synchronous>, transform_indices = @transform_5, window_bounds = array<i64: 1, 32>}, {pipeline_mode = #tpu.pipeline_mode<synchronous>, transform_indices = @transform_6, window_bounds = array<i64: 1, 32>}, {transform_indices = @transform_7, window_bounds = array<i64: 8, 32>}]} {
    %c0 = arith.constant 0 : index
    %c0_0 = arith.constant 0 : index
    %0 = vector.load %arg1[%c0, %c0_0] : memref<8x32xf32, #tpu.memory_space<vmem>>, vector<8x32xf32>
    %1 = arith.truncf %0 : vector<8x32xf32> to vector<8x32xbf16>
    %c0_1 = arith.constant 0 : index
    %c0_2 = arith.constant 0 : index
    %2 = vector.load %arg2[%c0_1, %c0_2] : memref<32x64xbf16, #tpu.memory_space<vmem>>, vector<32x64xbf16>
    %cst = arith.constant dense<0.000000e+00> : vector<8x64xf32>
    %3 = tpu.matmul %1, %2, %cst {dimension_numbers = #tpu.dot_dimension_numbers<[1], [0], [0], [1], [0, 0, 1, 1], [], []>} : vector<8x32xbf16>, vector<32x64xbf16>, vector<8x64xf32> -> vector<8x64xf32>
    %c0_3 = arith.constant 0 : index
    %c0_4 = arith.constant 0 : index
    %4 = vector.load %arg3[%c0_3, %c0_4] : memref<1x64xf32, #tpu.memory_space<vmem>>, vector<1x64xf32>
    %5 = vector.broadcast %4 : vector<1x64xf32> to vector<8x64xf32>
    %6 = arith.addf %3, %5 : vector<8x64xf32>
    %cst_5 = arith.constant 0.000000e+00 : f32
    %7 = vector.broadcast %cst_5 : f32 to vector<8x64xf32>
    %8 = arith.maximumf %6, %7 : vector<8x64xf32>
    %9 = arith.truncf %8 : vector<8x64xf32> to vector<8x64xbf16>
    %c0_6 = arith.constant 0 : index
    %c0_7 = arith.constant 0 : index
    %10 = vector.load %arg4[%c0_6, %c0_7] : memref<64x32xbf16, #tpu.memory_space<vmem>>, vector<64x32xbf16>
    %cst_8 = arith.constant dense<0.000000e+00> : vector<8x32xf32>
    %11 = tpu.matmul %9, %10, %cst_8 {dimension_numbers = #tpu.dot_dimension_numbers<[1], [0], [0], [1], [0, 0, 1, 1], [], []>} : vector<8x64xbf16>, vector<64x32xbf16>, vector<8x32xf32> -> vector<8x32xf32>
    %c0_9 = arith.constant 0 : index
    %c0_10 = arith.constant 0 : index
    %12 = vector.load %arg5[%c0_9, %c0_10] : memref<1x32xf32, #tpu.memory_space<vmem>>, vector<1x32xf32>
    %13 = vector.broadcast %12 : vector<1x32xf32> to vector<8x32xf32>
    %14 = arith.addf %11, %13 : vector<8x32xf32>
    %15 = arith.addf %0, %14 : vector<8x32xf32>
    %c0_11 = arith.constant 0 : index
    %c0_12 = arith.constant 0 : index
    %16 = vector.load %arg6[%c0_11, %c0_12] : memref<1x32xf32, #tpu.memory_space<vmem>>, vector<1x32xf32>
    %c0_13 = arith.constant 0 : index
    %c0_14 = arith.constant 0 : index
    %17 = vector.load %arg7[%c0_13, %c0_14] : memref<1x32xf32, #tpu.memory_space<vmem>>, vector<1x32xf32>
    %cst_15 = arith.constant dense<0.000000e+00> : vector<8xf32>
    %18 = vector.multi_reduction <add>, %15, %cst_15 [1] : vector<8x32xf32> to vector<8xf32>
    %19 = vector.shape_cast %18 : vector<8xf32> to vector<8x1xf32>
    %cst_16 = arith.constant 3.200000e+01 : f32
    %20 = vector.broadcast %cst_16 : f32 to vector<8x1xf32>
    %21 = arith.divf %19, %20 : vector<8x1xf32>
    %22 = vector.broadcast %21 : vector<8x1xf32> to vector<8x32xf32>
    %23 = arith.subf %15, %22 : vector<8x32xf32>
    %24 = arith.mulf %23, %23 : vector<8x32xf32>
    %cst_17 = arith.constant dense<0.000000e+00> : vector<8xf32>
    %25 = vector.multi_reduction <add>, %24, %cst_17 [1] : vector<8x32xf32> to vector<8xf32>
    %26 = vector.shape_cast %25 : vector<8xf32> to vector<8x1xf32>
    %cst_18 = arith.constant 3.200000e+01 : f32
    %27 = vector.broadcast %cst_18 : f32 to vector<8x1xf32>
    %28 = arith.divf %26, %27 : vector<8x1xf32>
    %29 = vector.broadcast %21 : vector<8x1xf32> to vector<8x32xf32>
    %30 = arith.subf %15, %29 : vector<8x32xf32>
    %cst_19 = arith.constant 9.99999974E-6 : f32
    %31 = vector.broadcast %cst_19 : f32 to vector<8x1xf32>
    %32 = arith.addf %28, %31 : vector<8x1xf32>
    %33 = math.rsqrt %32 : vector<8x1xf32>
    %34 = vector.broadcast %33 : vector<8x1xf32> to vector<8x32xf32>
    %35 = arith.mulf %30, %34 : vector<8x32xf32>
    %36 = vector.broadcast %16 : vector<1x32xf32> to vector<8x32xf32>
    %37 = arith.mulf %35, %36 : vector<8x32xf32>
    %38 = vector.broadcast %17 : vector<1x32xf32> to vector<8x32xf32>
    %39 = arith.addf %37, %38 : vector<8x32xf32>
    %c0_20 = arith.constant 0 : index
    %c0_21 = arith.constant 0 : index
    %40 = vector.load %arg8[%c0_20, %c0_21] : memref<8x32xf32, #tpu.memory_space<vmem>>, vector<8x32xf32>
    tpu.vector_store %arg8[%c0_20, %c0_21], %39 {strides = array<i32>} : memref<8x32xf32, #tpu.memory_space<vmem>>, vector<8x32xf32>,
    return
  }
  func.func @transform_0(%arg0: i32) -> (i32, i32) {
    %c0_i32 = arith.constant 0 : i32
    %c0_i32_0 = arith.constant 0 : i32
    return %arg0, %c0_i32 : i32, i32
  }
  func.func @transform_1(%arg0: i32) -> (i32, i32) {
    %c0_i32 = arith.constant 0 : i32
    %c0_i32_0 = arith.constant 0 : i32
    %c0_i32_1 = arith.constant 0 : i32
    return %c0_i32, %c0_i32_0 : i32, i32
  }
  func.func @transform_2(%arg0: i32) -> (i32, i32) {
    %c0_i32 = arith.constant 0 : i32
    %c0_i32_0 = arith.constant 0 : i32
    %c0_i32_1 = arith.constant 0 : i32
    return %c0_i32, %c0_i32_0 : i32, i32
  }
  func.func @transform_3(%arg0: i32) -> (i32, i32) {
    %c0_i32 = arith.constant 0 : i32
    %c0_i32_0 = arith.constant 0 : i32
    %c0_i32_1 = arith.constant 0 : i32
    return %c0_i32, %c0_i32_0 : i32, i32
  }
  func.func @transform_4(%arg0: i32) -> (i32, i32) {
    %c0_i32 = arith.constant 0 : i32
    %c0_i32_0 = arith.constant 0 : i32
    %c0_i32_1 = arith.constant 0 : i32
    return %c0_i32, %c0_i32_0 : i32, i32
  }
  func.func @transform_5(%arg0: i32) -> (i32, i32) {
    %c0_i32 = arith.constant 0 : i32
    %c0_i32_0 = arith.constant 0 : i32
    %c0_i32_1 = arith.constant 0 : i32
    return %c0_i32, %c0_i32_0 : i32, i32
  }
  func.func @transform_6(%arg0: i32) -> (i32, i32) {
    %c0_i32 = arith.constant 0 : i32
    %c0_i32_0 = arith.constant 0 : i32
    %c0_i32_1 = arith.constant 0 : i32
    return %c0_i32, %c0_i32_0 : i32, i32
  }
  func.func @transform_7(%arg0: i32) -> (i32, i32) {
    %c0_i32 = arith.constant 0 : i32
    %c0_i32_0 = arith.constant 0 : i32
    return %arg0, %c0_i32 : i32, i32
  }
}

</mosaic_0001>

<bundles_post_ra>
// kernel: lisa_encoder_layer.4
= control target key start
LH: loop header
LB: loop body
LE: loop exit
PB: predicated region body
PF: predicated region fallthrough
CT: control target
= control target key end

     0   :  { %s356_s12 = smov 0   ;;  %s382_s0 = inlined_call_operand.vmem [shape: f32[16,32], index: 0, kind: input, shape index: {}]   ;;  %s383_s1 = inlined_call_operand.vmem [shape: bf16[32,128], index: 1, kind: input, shape index: {}]   ;;  %s384_s2 = inlined_call_operand.vmem [shape: f32[1,128], index: 2, kind: input, shape index: {}]   ;;  %s385_s3 = inlined_call_operand.vmem [shape: f32[16,128], index: 3, kind: output, shape index: {}]  }
   0x1 LB: > { %s290_s13 = sadd.s32 4294967295, %s332_s12   ;;  %p294_p0 = scmp.ge.s32.totalorder %s332_s12, 1  ;;  %s332_s12 = sphi %s356_s12, %s13_s12  }
   0x2   : > { %p136_p1 = scmp.lt.s32.totalorder %s332_s12, 3 }
   0x4   : > { %p137_p2 = pnand %p294_p0, %p136_p1 }
   0x5   : > { %p158_p3 = scmp.lt.s32.totalorder (!%p137_p2), %s290_s13, 1 }
   0x6   : > { %140 = sbr.rel (%p137_p2) target bundleno = 219 (0xdb), region = 32 }
   0xb   : > { %v324_v0 = vld [vmem:[%s383_s1 + $0x8] sm:$0xff]   ;;  %v334_v1 = vmov 0.0   ;;  %v325_v2 = vld [vmem:[%s383_s1] sm:$0xff]   ;;  %vm335_vm0 = vmmov 0   ;;  %s387_s13 = smov (!%p158_p3, %s290_s13), 1  ;;  %vm192_vm1 = vcmask 261120  }
   0xc   : > { %306 = vmatprep.subr.bf16.mxu0 %v334_v1  ;;  %310 = vmatprep.mubr.msk.bf16.mxu0 %vm335_vm0, %v334_v1  ;;  %s295_s18 = sshll.u32 %s387_s13, 3  ;;  %v297_v5 = vld [vmem:[%s384_s2] ss:$0 sm:$0xff] }
   0xd   : > { %307 = vmatpush3.bf16.msra.mxu0 %v324_v0  ;;  %s161_s21 = scalar_lea.vmem %s382_s0, %s295_s18  ;;  %s165_s26 = scalar_lea.vmem %s385_s3, %s295_s18 }
   0xe   : > { %308 = vmatprep.subr.bf16.mxu0 %v334_v1  ;;  %v167_v3 = vld [vmem:[%s161_s21] sm:$0xff] }
   0xf   : > { %v168_v4 = vpack.c.bf16 %v167_v3, %v167_v3 }
  0x11   : > { %309 = vmatpush3.bf16.msra.mxu0 %v325_v2 }
  0x14   : > { %311 = vmatmul.mubr.msk.bf16.vlgmr.msra.gmra.mxu0 %vm192_vm1, %v168_v4 }
  0xd4   : > { %v230_v6 = vpop.f32.mrf.mxu0 }
  0xd5   : > { %v231_v7 = vadd.f32 %v297_v5, %v230_v6 }
  0xd6   : > { %v312_v8 = vpop.f32.mrf.mxu0 }
  0xd7   : > { %236 = vst [vmem:[%s165_s26] sm:$0xff] %v231_v7 }
  0xd8   : > { %v233_v9 = vpop.f32.mrf.mxu0 }
  0xda   : > { %v313_v10 = vpop.f32.mrf.mxu0 }
  0xdb PF: > { %s13_s12 = sadd.s32 1, %s332_s12  }
  0xdc   : > { %p10_p4 = scmp.ge.s32.totalorder %s13_s12, 4  }
  0xde   :  { %12 = sbr.rel (!%p10_p4) target bundleno = 1 (0x1), region = 62 }

// kernel: lisa_encoder_layer.6
= control target key start
LH: loop header
LB: loop body
LE: loop exit
PB: predicated region body
PF: predicated region fallthrough
CT: control target
= control target key end

     0   :  { %s518_s21 = smov 0   ;;  %s562_s0 = inlined_call_operand.vmem [shape: f32[16,32], index: 0, kind: input, shape index: {}]   ;;  %s563_s1 = inlined_call_operand.vmem [shape: f32[16,32], index: 1, kind: input, shape index: {}]   ;;  %s564_s2 = inlined_call_operand.vmem [shape: bf16[32,32], index: 2, kind: input, shape index: {}]   ;;  %s565_s3 = inlined_call_operand.vmem [shape: f32[1,32], index: 3, kind: input, shape index: {}]   ;;  %s566_s4 = inlined_call_operand.vmem [shape: f32[1,32], index: 4, kind: input, shape index: {}]   ;;  %s567_s5 = inlined_call_operand.vmem [shape: f32[1,32], index: 5, kind: input, shape index: {}]   ;;  %s568_s6 = inlined_call_operand.vmem [shape: f32[16,32], index: 6, kind: output, shape index: {}]  }
   0x1 LB: > { %s432_s22 = sadd.s32 4294967295, %s479_s21   ;;  %p436_p0 = scmp.ge.s32.totalorder %s479_s21, 1  ;;  %s479_s21 = sphi %s518_s21, %s16_s21  }
   0x2   : > { %p220_p1 = scmp.lt.s32.totalorder %s479_s21, 3 }
   0x4   : > { %p221_p2 = pnand %p436_p0, %p220_p1 }
   0x5   : > { %p252_p3 = scmp.lt.s32.totalorder (!%p221_p2), %s432_s22, 1 }
   0x6   : > { %224 = sbr.rel (%p221_p2) target bundleno = 526 (0x20e), region = 44 }
   0xb   : > { %v469_v0 = vld [vmem:[%s564_s2 + $0x8] sm:$0xff]   ;;  %v481_v1 = vmov 0.0   ;;  %v470_v2 = vld [vmem:[%s564_s2] sm:$0xff]   ;;  %vm482_vm0 = vmmov 0   ;;  %s570_s22 = smov (!%p252_p3, %s432_s22), 1  ;;  %vm290_vm1 = vcmask 261120  }
   0xc   : > { %451 = vmatprep.subr.bf16.mxu0 %v481_v1  ;;  %455 = vmatprep.mubr.msk.bf16.mxu0 %vm482_vm0, %v481_v1  ;;  %s532_s27 = sshll.u32 %s570_s22, 3  ;;  %v440_v5 = vld [vmem:[%s565_s3] ss:$0 sm:$0xff] }
   0xd   : > { %452 = vmatpush3.bf16.msra.mxu0 %v469_v0  ;;  %s255_s30 = scalar_lea.vmem %s562_s0, %s532_s27  ;;  %s259_s9 = scalar_lea.vmem %s563_s1, %s532_s27  ;;  %v444_v23 = vld [vmem:[%s566_s4] ss:$0 sm:$0xff] }
   0xe   : > { %453 = vmatprep.subr.bf16.mxu0 %v481_v1  ;;  %v265_v3 = vld [vmem:[%s255_s30] sm:$0xff]  ;;  %s263_s18 = scalar_lea.vmem %s568_s6, %s532_s27 }
   0xf   : > { %v266_v4 = vpack.c.bf16 %v265_v3, %v265_v3  ;;  %v334_v7 = vld [vmem:[%s259_s9] sm:$0xff] }
  0x10   : > { %v445_v25 = vld [vmem:[%s567_s5] ss:$0 sm:$0xff] }
  0x11   : > { %454 = vmatpush3.bf16.msra.mxu0 %v470_v2 }
  0x14   : > { %456 = vmatmul.mubr.msk.bf16.vlgmr.msra.gmra.mxu0 %vm290_vm1, %v266_v4 }
  0xd4   : > { %v328_v6 = vpop.f32.mrf.mxu0 }
  0xd5   : > { %v329_v8 = vadd.f32 %v440_v5, %v328_v6 }
  0xd6   : > { %v457_v9 = vpop.f32.mrf.mxu0 }
  0xd7   : > { %v335_v10 = vadd.f32 %v334_v7, %v329_v8 }
  0xd8   : > { %v331_v11 = vpop.f32.mrf.mxu0 }
  0xd9   : > { %v338_v12 = vsel %vm290_vm1, %v335_v10, 0.0 }
  0xda   : > { %339 = vadd.xlane.f32.xlu0 %v338_v12  ;;  %v458_v13 = vpop.f32.mrf.mxu0 }
 0x163   : > { %v340_v14 = vpop.xlane.xlu0 %339 }
 0x164   : > { %v342_v15 = vmul.f32 0.03125, %v340_v14 }
 0x166   : > { %v343_v16 = vsub.f32 %v335_v10, %v342_v15 }
 0x168   : > { %v344_v17 = vmul.f32 %v343_v16, %v343_v16 }
 0x16a   : > { %v345_v18 = vsel %vm290_vm1, %v344_v17, 0.0 }
 0x16b   : > { %346 = vadd.xlane.f32.xlu0 %v345_v18 }
 0x1f4   : > { %v347_v19 = vpop.xlane.xlu0 %346 }
 0x1f5   : > { %v348_v20 = vmul.f32 0.03125, %v347_v19 }
 0x1f7   : > { %v349_v21 = vadd.f32 1e-05, %v348_v20 }
 0x1f9   : > { %471 = vrsqrt.f32 %v349_v21 }
 0x206   : > { %v472_v22 = vpop.eup %471 }
 0x207   : > { %v351_v24 = vmul.f32 %v472_v22, %v343_v16 }
 0x209   : > { %v358_v26 = vmul.f32 %v444_v23, %v351_v24 }
 0x20b   : > { %v365_v27 = vadd.f32 %v445_v25, %v358_v26 }
 0x20d   : > { %366 = vst.msk [vmem:[%s263_s18] sm:$0xff] %vm290_vm1, %v365_v27 }
 0x20e PF: > { %s16_s21 = sadd.s32 1, %s479_s21  }
 0x20f   : > { %p13_p4 = scmp.ge.s32.totalorder %s16_s21, 4  }
 0x211   :  { %15 = sbr.rel (!%p13_p4) target bundleno = 1 (0x1), region = 77 }

// kernel: lisa_encoder_layer.5
= control target key start
LH: loop header
LB: loop body
LE: loop exit
PB: predicated region body
PF: predicated region fallthrough
CT: control target
= control target key end

     0   :  { %9 = vsyncpa [#allocation3], 0  ;;  %s1221_s0 = inlined_call_operand.vmem [shape: f32[2,8,128], index: 0, kind: input, shape index: {}]   ;;  %s1222_s1 = inlined_call_operand.vmem [shape: f32[2,1,8], index: 1, kind: input, shape index: {}]   ;;  %s1223_s2 = inlined_call_operand.vmem [shape: f32[2,8,32], index: 2, kind: output, shape index: {0}]   ;;  %s1224_s3 = inlined_call_operand.hbm [shape: f32[2,8,8], index: 3, kind: output, shape index: {1}]  }
   0x1   :  { %11 = vsyncpa [#allocation3 + $0x1], 0  ;;  %s1036_s12 = smov 0   ;;  %s1038_s13 = smov 0  }
   0x2   :  { %s1040_s14 = smov 0   ;;  %s1042_s15 = smov 0  }
   0x3 LB: > { %s1057_s16 = sadd.s32 4294967295, %s997_s15   ;;  %s782_s17 = sadd.s32 4294967294, %s997_s15   ;;  %s997_s15 = sphi %s1042_s15, %s1230_s15   ;;  %s993_s14 = sphi %s1040_s14, %s1229_s14   ;;  %s989_s13 = sphi %s1038_s13, %s1228_s13   ;;  %s985_s12 = sphi %s1036_s12, %s1227_s12  }
   0x4   : > { %s1061_s18 = sadd.s32 1, %s997_s15   ;;  %s102_s19 = sadd.s32 1, %s993_s14 }
   0x5   : > { %s99_s20 = ssub.s32 %s997_s15, %s1061_s18  ;;  %p112_p0 = scmp.ne.s32.totalorder %s993_s14, %s989_s13 }
   0x6   : > { %p100_p1 = scmp.eq.s32.totalorder %s99_s20, 0  ;;  %p113_p2 = scmp.eq.s32.totalorder %s1057_s16, 1 }
   0x7   : > { %p118_p3 = scmp.ne.s32.totalorder %s989_s13, %s985_s12  ;;  %p119_p4 = scmp.eq.s32.totalorder %s782_s17, 1 }
   0x8   : > { %s1072_s21 = scalar_select %p100_p1, %s993_s14, %s102_s19  }
   0x9   : > { %p1074_p5 = por %p113_p2, %p112_p0  ;;  %p1078_p6 = por %p119_p4, %p118_p3 }
   0xa   : > { %p785_p7 = scmp.ge.s32.totalorder %s997_s15, 1  ;;  %p150_p8 = scmp.lt.s32.totalorder %s997_s15, 3 }
   0xc   : > { %p151_p9 = pnand %p785_p7, %p150_p8 }
   0xd   : > { %p180_p10 = scmp.lt.s32.totalorder (!%p151_p9), %s1057_s16, 1  ;;  %s1001_s29 = smov (!%p151_p9), 16  }
   0xe   : > { %154 = sbr.rel (%p151_p9) target bundleno = 1513 (0x5e9), region = 28  ;;  %s1002_s30 = smov (!%p151_p9), 32  }
   0xf   : > { %s1003_s7 = smov (!%p151_p9), 64   ;;  %s1004_s8 = smov (!%p151_p9), 120  }
  0x10   : > { %s1005_s9 = smov (!%p151_p9), 80   ;;  %s1006_s10 = smov (!%p151_p9), 112  }
  0x11   : > { %s1007_s11 = smov (!%p151_p9), 72   ;;  %s1008_s17 = smov (!%p151_p9), 88  }
  0x12   : > { %s1009_s19 = smov (!%p151_p9), 104   ;;  %s177_s20 = sand.u32 (!%p151_p9), 1, %s989_s13  }
  0x13   : > { %v999_v0 = vmov 0.0   ;;  %vm1000_vm0 = vmmov 0   ;;  %s1089_s24 = scalar_select %p180_p10, %s1057_s16, 1  ;;  %vm200_vm1 = vcmask 130048   ;;  %vm255_vm2 = vcmask 64512  }
  0x14   : > { %818 = vmatprep.subr.bf16.mxu0 %v999_v0  ;;  %820 = vmatprep.mubr.msk.bf16.mxu0 %vm1000_vm0, %v999_v0  ;;  %vm274_vm3 = vcmask 1043456   ;;  %s1128_s26 = sshll.u32 %s177_s20, 3  ;;  %s1012_s4 = smov 48  }
  0x15   : > { %824 = vmatprep.subr.bf16.mxu1 %v999_v0  ;;  %826 = vmatprep.mubr.msk.bf16.mxu1 %vm1000_vm0, %v999_v0  ;;  %s787_s25 = sshll.u32 %s1089_s24, 3  ;;  %s186_s6 = scalar_lea.vmem %s1222_s1, %s1089_s24 }
  0x16   : > { %s183_s28 = scalar_lea.vmem %s1221_s0, %s787_s25  ;;  %v1114_v7 = vld [vmem:[%s186_s6] ss:$0 sm:$0xff]  ;;  %s179_s27 = scalar_lea.vmem [#allocation2], %s1128_s26 }
  0x17   : > { %v192_v1 = vld [vmem:[%s183_s28] sm:$0xff]  ;;  %s1010_s28 = smov 56   ;;  %s1013_s5 = smov 8  }
  0x18   : > { %v1100_v2 = vpack.c.bf16 %v192_v1, %v192_v1  ;;  %v318_v14 = vmul.f32 0.35355338, %v192_v1  ;;  %s799_s6 = sshll.u32 %s1057_s16, 7 }
  0x1a   : > { %198 = vrot.lane.b32.xlu0 %v1100_v2, %s1001_s29  ;;  %v319_v15 = vpack.c.bf16 %v318_v14, %v318_v14 }
  0x1e   : > { %196 = vrot.lane.b32.xlu0 %v1100_v2, %s1002_s30  ;;  %s1011_s30 = smov 40  }
  0x22   : > { %269 = vrot.lane.b32.xlu0 %v1100_v2, %s1003_s7  ;;  %s690_s7 = sshll.u32 %s179_s27, 4  ;;  %s691_s7 = int_to_ptr.vmem [resolvable:$true] %s690_s7 }
  0x26   : > { %321 = vrot.lane.b32.xlu0 %v319_v15, %s1004_s8 }
  0x2a   : > { %433 = vrot.lane.b32.xlu0 %v1100_v2, %s1005_s9 }
  0x2e   : > { %431 = vrot.lane.b32.xlu0 %v319_v15, %s1006_s10  ;;  %s688_s10 = scalar_lea.hbm %s1224_s3, %s799_s6 }
  0x32   : > { %543 = vrot.lane.b32.xlu0 %v1100_v2, %s1007_s11  ;;  %s674_s11 = scalar_lea.sflag [#allocation3], %s177_s20 }
  0x8c   : > { %v199_v3 = vpop.permute.xlu0 %198 }
  0x8d   : > { %v205_v4 = vsel %vm200_vm1, %v199_v3, 0 }
  0x8e   : > { %819 = vmatpush3.bf16.xpose.msra.mxu0 %v205_v4 }
  0x8f   : > { %836 = vmatprep.subr.bf16.mxu0 %v999_v0 }
  0x90   : > { %v197_v5 = vpop.permute.xlu0 %196 }
  0x94   : > { %v270_v21 = vpop.permute.xlu0 %269 }
  0x95   : > { %821 = vmatmul.mubr.msk.bf16.vlgmr.msra.gmra.mxu0 %vm200_vm1, %v197_v5  ;;  %v276_v22 = vsel %vm274_vm3, %v270_v21, 0 }
  0x96   : > { %838 = vmatprep.mubr.msk.bf16.mxu0 %vm1000_vm0, %v999_v0  ;;  %825 = vmatpush3.bf16.msra.mxu1 %v276_v22 }
  0x97   : > { %830 = vmatprep.subr.bf16.mxu1 %v999_v0 }
  0x98   : > { %v322_v24 = vpop.permute.xlu0 %321 }
  0x9c   : > { %v434_v30 = vpop.permute.xlu0 %433 }
  0x9d   : > { %v439_v32 = vsel %vm255_vm2, %v434_v30, 0 }
  0xa0   : > { %v432_v31 = vpop.permute.xlu0 %431 }
  0xa4   : > { %v544_v33 = vpop.permute.xlu0 %543 }
  0xa5   : > { %v549_v34 = vsel %vm255_vm2, %v544_v33, 0 }
 0x155   : > { %v241_v6 = vpop.f32.mrf.mxu0 }
 0x156   : > { %v247_v8 = vmul.f32 0.25, %v241_v6 }
 0x157   : > { %v822_v9 = vpop.f32.mrf.mxu0 }
 0x158   : > { %v254_v10 = vadd.f32 %v1114_v7, %v247_v8 }
 0x159   : > { %v244_v11 = vpop.f32.mrf.mxu0 }
 0x15a   : > { %v256_v12 = vsel %vm255_vm2, %v254_v10, -inf }
 0x15b   : > { %257 = vmax.xlane.f32.xlu1 %v256_v12  ;;  %v823_v13 = vpop.f32.mrf.mxu0 }
 0x1e4   : > { %v258_v16 = vpop.xlane.xlu1 %257 }
 0x1e5   : > { %v259_v17 = vsub.f32 %v254_v10, %v258_v16 }
 0x1e7   : > { %v260_v18 = vmul.f32 1.442695, %v259_v17 }
 0x1e9   : > { %921 = vpow2.f32 %v260_v18 }
 0x1f6   : > { %v922_v19 = vpop.eup %921 }
 0x1f7   : > { %v262_v20 = vsel %vm255_vm2, %v922_v19, 0.0 }
 0x1f8   : > { %263 = vadd.xlane.f32.xlu1 %v262_v20 }
 0x209   : > { %323 = vrot.lane.b32.xlu1 %v1100_v2, %s1008_s17  ;;  %s937_s17 = scalar_lea.vmem %s691_s7, 128 }
 0x20a   : > { %p938_p11 = scmp.ne.s32.totalorder %s691_s7, %s937_s17 }
 0x20c   : > { %p939_p12 = pnand %p938_p11, %p1074_p5 }
 0x20d   : > { %541 = vrot.lane.b32.xlu1 %v319_v15, %s1009_s19  ;;  %s1014_s19 = smov [#allocation2]  }
 0x20e   : > { %p940_p13 = pneg %p939_p12 }
 0x281   : > { %v264_v23 = vpop.xlane.xlu1 %263 }
 0x282   : > { %923 = vrcp.f32 %v264_v23 }
 0x285   : > { %v324_v26 = vpop.permute.xlu1 %323 }
 0x286   : > { %v329_v28 = vsel %vm255_vm2, %v324_v26, 0 }
 0x289   : > { %v542_v35 = vpop.permute.xlu1 %541 }
 0x28f   : > { %v924_v25 = vpop.eup %923 }
 0x290   : > { %v266_v27 = vmul.f32 %v924_v25, %v922_v19 }
 0x292   : > { %v268_v29 = vpack.c.bf16 %v266_v27, %v266_v27  ;;  %267 = vst.msk [vmem:[%s179_s27] sm:$0xff] %vm255_vm2, %v266_v27 }
 0x294   : > { %827 = vmatmul.mubr.msk.bf16.vlgmr.msra.gmra.mxu1 %vm255_vm2, %v268_v29 }
 0x295   : > { %831 = vmatpush3.bf16.xpose.msra.mxu1 %v329_v28  ;;  %832 = vmatprep.mubr.msk.bf16.mxu1 %vm1000_vm0, %v999_v0 }
 0x296   : > { %842 = vmatprep.subr.bf16.mxu1 %v999_v0 }
 0x29c   : > { %833 = vmatmul.mubr.msk.bf16.vlgmr.msra.gmra.mxu1 %vm255_vm2, %v322_v24 }
 0x29d   : > { %843 = vmatpush3.bf16.xpose.msra.mxu1 %v439_v32  ;;  %844 = vmatprep.mubr.msk.bf16.mxu1 %vm1000_vm0, %v999_v0 }
 0x29e   : > { %854 = vmatprep.subr.bf16.mxu1 %v999_v0 }
 0x2a4   : > { %845 = vmatmul.mubr.msk.bf16.vlgmr.msra.gmra.mxu1 %vm255_vm2, %v432_v31 }
 0x2a5   : > { %855 = vmatpush3.bf16.xpose.msra.mxu1 %v549_v34  ;;  %856 = vmatprep.mubr.msk.bf16.mxu1 %vm1000_vm0, %v999_v0 }
 0x2ac   : > { %857 = vmatmul.mubr.msk.bf16.vlgmr.msra.gmra.mxu1 %vm255_vm2, %v542_v35 }
 0x354   : > { %v1149_v36 = vpop.f32.mrf.mxu1 }
 0x356   : > { %v828_v37 = vpop.f32.mrf.mxu1 }
 0x358   : > { %v315_v38 = vpop.f32.mrf.mxu1 }
 0x35a   : > { %v829_v39 = vpop.f32.mrf.mxu1 }
 0x35c   : > { %v365_v40 = vpop.f32.mrf.mxu1 }
 0x35d   : > { %v366_v41 = vadd.f32 %v1114_v7, %v365_v40 }
 0x35e   : > { %v834_v42 = vpop.f32.mrf.mxu1 }
 0x35f   : > { %v371_v43 = vsel %vm255_vm2, %v366_v41, -inf }
 0x360   : > { %372 = vmax.xlane.f32.xlu0 %v371_v43  ;;  %v368_v44 = vpop.f32.mrf.mxu1 }
 0x362   : > { %v835_v45 = vpop.f32.mrf.mxu1 }
 0x364   : > { %v475_v46 = vpop.f32.mrf.mxu1 }
 0x365   : > { %v476_v47 = vadd.f32 %v1114_v7, %v475_v46 }
 0x366   : > { %v846_v48 = vpop.f32.mrf.mxu1 }
 0x367   : > { %v481_v49 = vsel %vm255_vm2, %v476_v47, -inf }
 0x368   : > { %482 = vmax.xlane.f32.xlu1 %v481_v49  ;;  %v478_v50 = vpop.f32.mrf.mxu1 }
 0x36a   : > { %v847_v51 = vpop.f32.mrf.mxu1 }
 0x36c   : > { %v585_v52 = vpop.f32.mrf.mxu1 }
 0x36d   : > { %v586_v53 = vadd.f32 %v1114_v7, %v585_v52 }
 0x36e   : > { %v858_v54 = vpop.f32.mrf.mxu1 }
 0x36f   : > { %v591_v55 = vsel %vm255_vm2, %v586_v53, -inf }
 0x370   : > { %592 = vmax.xlane.f32.xlu0 %v591_v55  ;;  %v588_v56 = vpop.f32.mrf.mxu1 }
 0x372   : > { %v859_v57 = vpop.f32.mrf.mxu1 }
 0x379   : > { %383 = vrot.lane.b32.xlu1 %v1100_v2, %s1010_s28  ;;  %s941_s28 = sshll.u32 %s1014_s19, 4  ;;  %s942_s28 = int_to_ptr.vmem [resolvable:$false] %s941_s28 }
 0x37a   : > { %s943_s16 = scalar_lea.vmem %s942_s28, 256  ;;  %p944_p0 = scmp.lt.s32.totalorder %s691_s7, %s942_s28 }
 0x37b   : > { %p945_p1 = scmp.lt.s32.totalorder %s943_s16, %s937_s17 }
 0x37d   : > { %p946_p2 = por %p945_p1, %p944_p0 }
 0x37f   : > { %p947_p3 = pnand %p946_p2, %p940_p13 }
 0x3e9   : > { %v373_v58 = vpop.xlane.xlu0 %372 }
 0x3ea   : > { %v374_v59 = vsub.f32 %v366_v41, %v373_v58 }
 0x3ec   : > { %v375_v60 = vmul.f32 1.442695, %v374_v59 }
 0x3ee   : > { %925 = vpow2.f32 %v375_v60 }
 0x3f1   : > { %v483_v61 = vpop.xlane.xlu1 %482 }
 0x3f2   : > { %v484_v62 = vsub.f32 %v476_v47, %v483_v61 }
 0x3f4   : > { %v485_v63 = vmul.f32 1.442695, %v484_v62 }
 0x3f5   : > { %v384_v1 = vpop.permute.xlu1 %383 }
 0x3f6   : > { %927 = vpow2.f32 %v485_v63  ;;  %v389_v3 = vsel %vm274_vm3, %v384_v1, 0 }
 0x3f7   : > { %837 = vmatpush3.bf16.msra.mxu0 %v389_v3 }
 0x3f8   : > { %848 = vmatprep.subr.bf16.mxu0 %v999_v0 }
 0x3f9   : > { %v593_v4 = vpop.xlane.xlu0 %592 }
 0x3fa   : > { %v594_v5 = vsub.f32 %v586_v53, %v593_v4 }
 0x3fb   : > { %v926_v6 = vpop.eup %925 }
 0x3fc   : > { %v595_v7 = vmul.f32 1.442695, %v594_v5  ;;  %v377_v8 = vsel %vm255_vm2, %v926_v6, 0.0 }
 0x3fd   : > { %378 = vadd.xlane.f32.xlu0 %v377_v8 }
 0x3fe   : > { %929 = vpow2.f32 %v595_v7 }
 0x403   : > { %v928_v9 = vpop.eup %927 }
 0x404   : > { %v487_v10 = vsel %vm255_vm2, %v928_v9, 0.0 }
 0x405   : > { %488 = vadd.xlane.f32.xlu1 %v487_v10 }
 0x40b   : > { %v930_v11 = vpop.eup %929 }
 0x40c   : > { %v597_v12 = vsel %vm255_vm2, %v930_v11, 0.0 }
 0x40d   : > { %598 = vadd.xlane.f32.xlu0 %v597_v12 }
 0x416   : > { %603 = vrot.lane.b32.xlu1 %v1100_v2, %s1011_s30 }
 0x423   : > { %493 = vrot.lane.b32.xlu0 %v1100_v2, %s1012_s4 }
 0x486   : > { %v379_v13 = vpop.xlane.xlu0 %378 }
 0x487   : > { %931 = vrcp.f32 %v379_v13 }
 0x48e   : > { %v489_v14 = vpop.xlane.xlu1 %488 }
 0x48f   : > { %933 = vrcp.f32 %v489_v14 }
 0x492   : > { %v604_v2 = vpop.permute.xlu1 %603 }
 0x493   : > { %v609_v24 = vsel %vm274_vm3, %v604_v2, 0 }
 0x494   : > { %v932_v15 = vpop.eup %931 }
 0x495   : > { %v381_v16 = vmul.f32 %v932_v15, %v926_v6 }
 0x496   : > { %v599_v17 = vpop.xlane.xlu0 %598 }
 0x497   : > { %935 = vrcp.f32 %v599_v17  ;;  %v382_v18 = vpack.c.bf16 %v381_v16, %v381_v16 }
 0x499   : > { %839 = vmatmul.mubr.msk.bf16.vlgmr.msra.gmra.mxu0 %vm255_vm2, %v382_v18 }
 0x49a   : > { %v494_v19 = vpop.permute.xlu0 %493  ;;  %850 = vmatprep.mubr.msk.bf16.mxu0 %vm1000_vm0, %v999_v0 }
 0x49b   : > { %v499_v20 = vsel %vm274_vm3, %v494_v19, 0 }
 0x49c   : > { %v934_v21 = vpop.eup %933  ;;  %849 = vmatpush3.bf16.msra.mxu0 %v499_v20 }
 0x49d   : > { %v491_v22 = vmul.f32 %v934_v21, %v928_v9  ;;  %860 = vmatprep.subr.bf16.mxu0 %v999_v0 }
 0x49f   : > { %v492_v23 = vpack.c.bf16 %v491_v22, %v491_v22 }
 0x4a1   : > { %851 = vmatmul.mubr.msk.bf16.vlgmr.msra.gmra.mxu0 %vm255_vm2, %v492_v23 }
 0x4a2   : > { %861 = vmatpush3.bf16.msra.mxu0 %v609_v24  ;;  %862 = vmatprep.mubr.msk.bf16.mxu0 %vm1000_vm0, %v999_v0 }
 0x4a4   : > { %v936_v25 = vpop.eup %935 }
 0x4a5   : > { %v601_v26 = vmul.f32 %v936_v25, %v930_v11 }
 0x4a7   : > { %v602_v27 = vpack.c.bf16 %v601_v26, %v601_v26 }
 0x4a9   : > { %863 = vmatmul.mubr.msk.bf16.vlgmr.msra.gmra.mxu0 %vm255_vm2, %v602_v27 }
 0x559   : > { %v425_v28 = vpop.f32.mrf.mxu0 }
 0x55a   : > { %652 = vrot.lane.b32.xlu1 %v425_v28, %s1013_s5 }
 0x55b   : > { %v840_v29 = vpop.f32.mrf.mxu0 }
 0x55d   : > { %v428_v30 = vpop.f32.mrf.mxu0 }
 0x55f   : > { %v841_v0 = vpop.f32.mrf.mxu0 }
 0x560   : > { %950 = shalt.err (!%p947_p3)
}
 0x561   : > { %s951_s26 = scalar_lea.hbm %s688_s10, 128  ;;  %s955_s30 = scalar_lea.hbm %s1224_s3, 256 }
 0x562   : > { %p952_p4 = scmp.ne.s32.totalorder %s688_s10, %s951_s26  ;;  %p956_p9 = scmp.lt.s32.totalorder %s688_s10, %s1224_s3 }
 0x563   : > { %p957_p10 = scmp.lt.s32.totalorder %s955_s30, %s951_s26 }
 0x564   : > { %p953_p7 = pnand %p952_p4, %p1074_p5 }
 0x565   : > { %p958_p11 = por %p957_p10, %p956_p9 }
 0x566   : > { %p954_p8 = pneg %p953_p7 }
 0x568   : > { %p959_p12 = pnand %p958_p11, %p954_p8 }
 0x56a   : > { %962 = shalt.err (!%p959_p12)
}
 0x56b   : > { %866 = dma.vmem_to_hbm [thread:$0]  (%p1074_p5), %s691_s7, 128, %s688_s10, %s674_s11   ;;  %v535_v31 = vpop.f32.mrf.mxu0  ;;  %vm665_vm4 = vcmask 195584   ;;  %vm667_vm5 = vcmask 261120  }
 0x56c   : > { %656 = vrot.lane.b32.xlu0 %v535_v31, %s1001_s29  ;;  %s1015_s6 = smov 24   ;;  %s190_s29 = scalar_lea.vmem %s1223_s2, %s787_s25 }
 0x56d   : > { %v852_v32 = vpop.f32.mrf.mxu0 }
 0x56f   : > { %v538_v33 = vpop.f32.mrf.mxu0 }
 0x571   : > { %v853_v34 = vpop.f32.mrf.mxu0 }
 0x573   : > { %v645_v35 = vpop.f32.mrf.mxu0 }
 0x574   : > { %660 = vrot.lane.b32.xlu1 %v645_v35, %s1015_s6 }
 0x575   : > { %v864_v37 = vpop.f32.mrf.mxu0 }
 0x577   : > { %v648_v38 = vpop.f32.mrf.mxu0 }
 0x579   : > { %v865_v39 = vpop.f32.mrf.mxu0 }
 0x5cc   : > { %v653_v40 = vpop.permute.xlu1 %652 }
 0x5cd   : > { %v663_v42 = vsel %vm255_vm2, %v1149_v36, %v653_v40 }
 0x5de   : > { %v657_v41 = vpop.permute.xlu0 %656 }
 0x5df   : > { %v664_v43 = vsel %vm200_vm1, %v663_v42, %v657_v41 }
 0x5e6   : > { %v661_v44 = vpop.permute.xlu1 %660 }
 0x5e7   : > { %v666_v45 = vsel %vm665_vm4, %v664_v43, %v661_v44 }
 0x5e8   : > { %668 = vst.msk [vmem:[%s190_s29] sm:$0xff] %vm667_vm5, %v666_v45 }
 0x5e9 PF: > { %p872_p5 = scmp.ge.s32.totalorder %s997_s15, 2  ;;  %s709_s8 = sand.u32 1, %s985_s12  }
 0x5ea   : > { %s710_s24 = scalar_lea.sflag [#allocation3], %s709_s8 }
 0x5eb   : > { %p869_p13 = pnand %p872_p5, %p1078_p6 }
 0x5ed   : > { %p870_p0 = pneg %p869_p13 }
 0x5ef   : > { %980 = dma.done.wait (%p870_p0), %s710_s24, 128  }
 0x5f0   : > { %982 = vsyncadd (%p870_p0), %s710_s24, 4294967168  ;;  %p14_p1 = scmp.ge.s32.totalorder %s1061_s18, 4   ;;  %s1227_s12 = smov %s989_s13 }
 0x5f1   : > { %s1228_s13 = smov %s993_s14  ;;  %s1229_s14 = smov %s1072_s21 }
 0x5f2   : > { %s1230_s15 = smov %s1061_s18  ;;  %16 = sbr.rel (!%p14_p1) target bundleno = 3 (0x3), region = 78 }
 0x5f7   :  { %715 = vsyncpa [#allocation3], 1 }
 0x5f8   :  { %717 = vsyncpa [#allocation3 + $0x1], 1 }

// kernel: lisa_encoder_layer.7
= control target key start
LH: loop header
LB: loop body
LE: loop exit
PB: predicated region body
PF: predicated region fallthrough
CT: control target
= control target key end

     0   :  { %s631_s24 = smov 0   ;;  %s689_s0 = inlined_call_operand.vmem [shape: f32[16,32], index: 0, kind: input, shape index: {}]   ;;  %s690_s1 = inlined_call_operand.vmem [shape: bf16[32,64], index: 1, kind: input, shape index: {}]   ;;  %s691_s2 = inlined_call_operand.vmem [shape: f32[1,64], index: 2, kind: input, shape index: {}]   ;;  %s692_s3 = inlined_call_operand.vmem [shape: bf16[64,32], index: 3, kind: input, shape index: {}]   ;;  %s693_s4 = inlined_call_operand.vmem [shape: f32[1,32], index: 4, kind: input, shape index: {}]   ;;  %s694_s5 = inlined_call_operand.vmem [shape: f32[1,32], index: 5, kind: input, shape index: {}]   ;;  %s695_s6 = inlined_call_operand.vmem [shape: f32[1,32], index: 6, kind: input, shape index: {}]   ;;  %s696_s7 = inlined_call_operand.vmem [shape: f32[16,32], index: 7, kind: output, shape index: {}]  }
   0x1 LB: > { %s514_s25 = sadd.s32 4294967295, %s587_s24   ;;  %p518_p0 = scmp.ge.s32.totalorder %s587_s24, 1  ;;  %s587_s24 = sphi %s631_s24, %s17_s24  }
   0x2   : > { %p236_p1 = scmp.lt.s32.totalorder %s587_s24, 3 }
   0x4   : > { %p237_p2 = pnand %p518_p0, %p236_p1 }
   0x5   : > { %p266_p3 = scmp.lt.s32.totalorder (!%p237_p2), %s514_s25, 1 }
   0x6   : > { %240 = sbr.rel (%p237_p2) target bundleno = 725 (0x2d5), region = 48 }
   0xb   : > { %v573_v0 = vld [vmem:[%s690_s1 + $0x8] sm:$0xff]   ;;  %v589_v1 = vmov 0.0   ;;  %v574_v2 = vld [vmem:[%s690_s1] sm:$0xff]   ;;  %vm590_vm0 = vmmov 0   ;;  %v575_v3 = vld [vmem:[%s692_s3 + $0x18] sm:$0xff]   ;;  %s698_s25 = smov (!%p266_p3, %s514_s25), 1 }
   0xc   : > { %543 = vmatprep.subr.bf16.mxu0 %v589_v1  ;;  %551 = vmatprep.subr.bf16.mxu1 %v589_v1  ;;  %v576_v4 = vld [vmem:[%s692_s3 + $0x10] sm:$0xff]   ;;  %s519_s11 = sshll.u32 %s698_s25, 3  ;;  %vm300_vm1 = vcmask 261120   ;;  %v577_v7 = vld [vmem:[%s692_s3 + $0x8] sm:$0xff]   ;;  %v578_v8 = vld [vmem:[%s692_s3] sm:$0xff]   ;;  %vm385_vm2 = vcmask 523264  }
   0xd   : > { %544 = vmatpush3.bf16.msra.mxu0 %v573_v0  ;;  %547 = vmatprep.mubr.msk.bf16.mxu0 %vm590_vm0, %v589_v1  ;;  %s269_s14 = scalar_lea.vmem %s689_s0, %s519_s11  ;;  %v521_v9 = vld [vmem:[%s691_s2] ss:$0 sm:$0xff]  ;;  %s273_s8 = scalar_lea.vmem %s696_s7, %s519_s11 }
   0xe   : > { %545 = vmatprep.subr.bf16.mxu0 %v589_v1  ;;  %559 = vmatprep.mubr.msk.bf16.mxu1 %vm590_vm0, %v589_v1  ;;  %v275_v5 = vld [vmem:[%s269_s14] sm:$0xff] }
   0xf   : > { %552 = vmatpush3.bf16.msra.mxu1 %v575_v3  ;;  %v276_v6 = vpack.c.bf16 %v275_v5, %v275_v5  ;;  %v525_v17 = vld [vmem:[%s693_s4] ss:$0 sm:$0xff] }
  0x10   : > { %553 = vmatprep.subr.bf16.mxu1 %v589_v1  ;;  %v531_v34 = vld [vmem:[%s694_s5] ss:$0 sm:$0xff] }
  0x11   : > { %546 = vmatpush3.bf16.msra.mxu0 %v574_v2  ;;  %v532_v36 = vld [vmem:[%s695_s6] ss:$0 sm:$0xff] }
  0x13   : > { %554 = vmatpush3.bf16.msra.mxu1 %v576_v4 }
  0x14   : > { %555 = vmatprep.subr.bf16.mxu1 %v589_v1  ;;  %548 = vmatmul.mubr.msk.bf16.vlgmr.msra.gmra.mxu0 %vm300_vm1, %v276_v6 }
  0x17   : > { %556 = vmatpush3.bf16.msra.mxu1 %v577_v7 }
  0x18   : > { %557 = vmatprep.subr.bf16.mxu1 %v589_v1 }
  0x1b   : > { %558 = vmatpush3.bf16.msra.mxu1 %v578_v8 }
  0xd4   : > { %v338_v10 = vpop.f32.mrf.mxu0 }
  0xd5   : > { %v339_v11 = vadd.f32 %v521_v9, %v338_v10 }
  0xd6   : > { %v549_v12 = vpop.f32.mrf.mxu0 }
  0xd7   : > { %v344_v13 = vmax.f32 %v339_v11, 0.0 }
  0xd8   : > { %v341_v14 = vpop.f32.mrf.mxu0 }
  0xd9   : > { %v345_v15 = vpack.c.bf16 %v344_v13, %v344_v13 }
  0xda   : > { %v550_v16 = vpop.f32.mrf.mxu0 }
  0xdb   : > { %560 = vmatmul.mubr.msk.bf16.vlgmr.msra.gmra.mxu1 %vm385_vm2, %v345_v15 }
 0x19b   : > { %v423_v18 = vpop.f32.mrf.mxu1 }
 0x19c   : > { %v424_v19 = vadd.f32 %v525_v17, %v423_v18 }
 0x19d   : > { %v561_v20 = vpop.f32.mrf.mxu1 }
 0x19e   : > { %v429_v21 = vadd.f32 %v424_v19, %v275_v5 }
 0x19f   : > { %v426_v22 = vpop.f32.mrf.mxu1 }
 0x1a0   : > { %v432_v23 = vsel %vm300_vm1, %v429_v21, 0.0 }
 0x1a1   : > { %433 = vadd.xlane.f32.xlu0 %v432_v23  ;;  %v562_v24 = vpop.f32.mrf.mxu1 }
 0x22a   : > { %v434_v25 = vpop.xlane.xlu0 %433 }
 0x22b   : > { %v436_v26 = vmul.f32 0.03125, %v434_v25 }
 0x22d   : > { %v437_v27 = vsub.f32 %v429_v21, %v436_v26 }
 0x22f   : > { %v438_v28 = vmul.f32 %v437_v27, %v437_v27 }
 0x231   : > { %v439_v29 = vsel %vm300_vm1, %v438_v28, 0.0 }
 0x232   : > { %440 = vadd.xlane.f32.xlu0 %v439_v29 }
 0x2bb   : > { %v441_v30 = vpop.xlane.xlu0 %440 }
 0x2bc   : > { %v442_v31 = vmul.f32 0.03125, %v441_v30 }
 0x2be   : > { %v443_v32 = vadd.f32 1e-05, %v442_v31 }
 0x2c0   : > { %579 = vrsqrt.f32 %v443_v32 }
 0x2cd   : > { %v580_v33 = vpop.eup %579 }
 0x2ce   : > { %v445_v35 = vmul.f32 %v580_v33, %v437_v27 }
 0x2d0   : > { %v452_v37 = vmul.f32 %v531_v34, %v445_v35 }
 0x2d2   : > { %v459_v38 = vadd.f32 %v532_v36, %v452_v37 }
 0x2d4   : > { %460 = vst.msk [vmem:[%s273_s8] sm:$0xff] %vm300_vm1, %v459_v38 }
 0x2d5 PF: > { %s17_s24 = sadd.s32 1, %s587_s24  }
 0x2d6   : > { %p14_p4 = scmp.ge.s32.totalorder %s17_s24, 4  }
 0x2d8   :  { %16 = sbr.rel (!%p14_p4) target bundleno = 1 (0x1), region = 78 }

</bundles_post_ra>
